<compile_context>
chip_gen: v5e
topology: v5e:2x2
jax: 0.10.0
libtpu: 0.0.40
codegen_flags: <defaults>
</compile_context>

<pallas_src>
import jax
import jax.numpy as jnp
from jax.experimental import pallas as pl
from jax.experimental.pallas import tpu as pltpu


def _projection_kernel(x_ref, w_ref, b_ref, o_ref):
    # x_ref: (B_blk, Cin, TL)  tile (NCL layout, L on lanes)
    # w_ref: (Cout, Cin)       resident weight
    # b_ref: (Cout, 1)         resident bias (broadcasts over lanes)
    # o_ref: (B_blk, Cout, TL)
    w = w_ref[...]
    b = b_ref[...]
    for i in range(x_ref.shape[0]):  # B_blk is small and static
        y = jnp.dot(w, x_ref[i], preferred_element_type=jnp.float32)
        o_ref[i] = jnp.maximum(y + b, 0.0).astype(o_ref.dtype)


def projection_forward(x, weight, bias, *, tl_max=2048):
    """Equivalent of `relu(Conv1d(Cin, Cout, kernel_size=1)(x))`.

    x:      (N, Cin, L)    (NCL, same as PyTorch)
    weight: (Cout, Cin, 1) (PyTorch Conv1d weight layout)
    bias:   (Cout,)
    returns (N, Cout, L)
    """
    N, Cin, L = x.shape
    Cout = weight.shape[0]
    itemsize = jnp.dtype(x.dtype).itemsize

    # ---- L tiling (lane axis). No pad/slice round-trips: ragged last tile is
    # handled by Pallas boundary masking on the output store.
    if L <= tl_max:
        TL = L            # one full-extent tile (any L allowed by the layout rules)
    else:
        TL = tl_max       # multiple of 128 -> lane-dense, unmasked stores
    grid_l = pl.cdiv(L, TL)

    # ---- Small-L regime: fold batch elements into one grid step to amortize
    # the ~0.35 us per-step overhead, but keep >= 2 total steps (v7x megacore)
    # and keep the double-buffered x tile under ~14 MiB (v5e scoped VMEM = 16 MiB).
    B_blk = 1
    if grid_l == 1 and L <= 256:
        for cand in (8, 4, 2):
            if (N % cand == 0 and N // cand >= 2
                    and 2 * cand * Cin * TL * itemsize <= 14 * 1024 * 1024):
                B_blk = cand
                break
    grid_n = N // B_blk

    # ---- Megacore guard: if only one grid step total, split L into two tiles
    # so both v7x TensorCores get work (no effect on single-TC v5e/v6e).
    if grid_n * grid_l < 2 and L >= 256:
        half = -(-L // 2)
        TL = -(-half // 128) * 128       # multiple of 128; 2nd tile ragged/masked
        grid_l = pl.cdiv(L, TL)

    w2d = weight[:, :, 0]                # (Cout, Cin)
    b2d = bias.reshape(Cout, 1)          # (Cout, 1) broadcasts over the lane (L) axis

    out = pl.pallas_call(
        _projection_kernel,
        out_shape=jax.ShapeDtypeStruct((N, Cout, L), x.dtype),
        grid=(grid_n, grid_l),
        in_specs=[
            # x: B_blk batch elements, Cin x TL tile each (L on lanes).
            pl.BlockSpec((B_blk, Cin, TL), lambda n, l: (n, 0, l)),
            # weight / bias: resident across all grid steps.
            pl.BlockSpec((Cout, Cin), lambda n, l: (0, 0)),
            pl.BlockSpec((Cout, 1), lambda n, l: (0, 0)),
        ],
        out_specs=pl.BlockSpec((B_blk, Cout, TL), lambda n, l: (n, 0, l)),
        compiler_params=pltpu.CompilerParams(
            dimension_semantics=("parallel", "parallel"),
        ),
        cost_estimate=pl.CostEstimate(
            flops=2 * N * L * Cin * Cout,
            bytes_accessed=itemsize * (N * Cin * L + Cin * Cout + Cout + N * Cout * L),
            transcendentals=0,
        ),
    )(x, w2d, b2d)
    return out


# NOTE: nn.Dropout and nn.Flatten are constructed in __init__ but never used in
# forward(), so they are intentionally not part of the kernel.

if __name__ == "__main__":
    key = jax.random.PRNGKey(0)

    def ref_fn(x, w, b):
        return jnp.maximum(
            jnp.einsum("ncl,oc->nol", x, w[:, :, 0]) + b[None, :, None], 0.0
        )

    # Case 1: module-default channels, tiny L (Conv1d(768 -> 64, k=1), L=8).
    k1, k2, k3, key = jax.random.split(key, 4)
    N, Cin, Cout, L = 2, 768, 64, 8
    bound = 1.0 / jnp.sqrt(jnp.float32(Cin))
    x = jax.random.normal(k1, (N, Cin, L), dtype=jnp.float32)
    weight = jax.random.uniform(k2, (Cout, Cin, 1), minval=-bound, maxval=bound,
                                dtype=jnp.float32)
    bias = jax.random.uniform(k3, (Cout,), minval=-bound, maxval=bound,
                              dtype=jnp.float32)
    out = jax.block_until_ready(projection_forward(x, weight, bias))
    assert out.shape == (N, Cout, L)
    assert jnp.allclose(out, ref_fn(x, weight, bias), atol=1e-5, rtol=1e-5)

    # Case 2: ragged multi-tile L (exercises Pallas boundary masking, no pad/slice).
    k1, k2, k3, key = jax.random.split(key, 4)
    N, Cin, Cout, L = 3, 256, 64, 300
    bound = 1.0 / jnp.sqrt(jnp.float32(Cin))
    x = jax.random.normal(k1, (N, Cin, L), dtype=jnp.float32)
    weight = jax.random.uniform(k2, (Cout, Cin, 1), minval=-bound, maxval=bound,
                                dtype=jnp.float32)
    bias = jax.random.uniform(k3, (Cout,), minval=-bound, maxval=bound,
                              dtype=jnp.float32)
    out = jax.block_until_ready(projection_forward(x, weight, bias, tl_max=128))
    assert out.shape == (N, Cout, L)
    assert jnp.allclose(out, ref_fn(x, weight, bias), atol=1e-5, rtol=1e-5)

    print("KERNEL_OK")
</pallas_src>

<mosaic_0001>
module attributes {stable_mosaic.version = 11 : i64} {
  func.func @_projection_kernel(%arg0: i32, %arg1: i32, %arg2: memref<1x768x8xf32, #tpu.memory_space<vmem>>, %arg3: memref<64x768xf32, #tpu.memory_space<vmem>>, %arg4: memref<64x1xf32, #tpu.memory_space<vmem>>, %arg5: memref<1x64x8xf32, #tpu.memory_space<vmem>>) attributes {dimension_semantics = [#tpu.dimension_semantics<parallel>, #tpu.dimension_semantics<parallel>], iteration_bounds = array<i64: 2, 1>, scalar_prefetch = 0 : i64, scratch_operands = 0 : i64, tpu.core_type = #tpu.core_type<tc>, window_params = [{transform_indices = @transform_0, window_bounds = array<i64: 1, 768, 8>}, {pipeline_mode = #tpu.pipeline_mode<synchronous>, transform_indices = @transform_1, window_bounds = array<i64: 64, 768>}, {pipeline_mode = #tpu.pipeline_mode<synchronous>, transform_indices = @transform_2, window_bounds = array<i64: 64, 1>}, {transform_indices = @transform_3, window_bounds = array<i64: 1, 64, 8>}]} {
    %c0 = arith.constant 0 : index
    %c0_0 = arith.constant 0 : index
    %0 = vector.load %arg3[%c0, %c0_0] : memref<64x768xf32, #tpu.memory_space<vmem>>, vector<64x768xf32>
    %c0_1 = arith.constant 0 : index
    %c0_2 = arith.constant 0 : index
    %1 = vector.load %arg4[%c0_1, %c0_2] : memref<64x1xf32, #tpu.memory_space<vmem>>, vector<64x1xf32>
    %c0_3 = arith.constant 0 : index
    %c0_4 = arith.constant 0 : index
    %c0_5 = arith.constant 0 : index
    %2 = vector.load %arg2[%c0_3, %c0_4, %c0_5] : memref<1x768x8xf32, #tpu.memory_space<vmem>>, vector<1x768x8xf32>
    %3 = vector.shape_cast %2 : vector<1x768x8xf32> to vector<768x8xf32>
    %cst = arith.constant dense<0.000000e+00> : vector<64x8xf32>
    %4 = tpu.matmul %0, %3, %cst {dimension_numbers = #tpu.dot_dimension_numbers<[1], [0], [0], [1], [0, 0, 1, 1], [], []>} : vector<64x768xf32>, vector<768x8xf32>, vector<64x8xf32> -> vector<64x8xf32>
    %5 = vector.broadcast %1 : vector<64x1xf32> to vector<64x8xf32>
    %6 = arith.addf %4, %5 : vector<64x8xf32>
    %cst_6 = arith.constant 0.000000e+00 : f32
    %7 = vector.broadcast %cst_6 : f32 to vector<64x8xf32>
    %8 = arith.maximumf %6, %7 : vector<64x8xf32>
    %c0_7 = arith.constant 0 : index
    %c0_8 = arith.constant 0 : index
    %c0_9 = arith.constant 0 : index
    %9 = vector.load %arg5[%c0_7, %c0_8, %c0_9] : memref<1x64x8xf32, #tpu.memory_space<vmem>>, vector<1x64x8xf32>
    %10 = vector.shape_cast %9 : vector<1x64x8xf32> to vector<64x8xf32>
    %11 = vector.shape_cast %8 : vector<64x8xf32> to vector<1x64x8xf32>
    tpu.vector_store %arg5[%c0_7, %c0_8, %c0_9], %11 {strides = array<i32>} : memref<1x64x8xf32, #tpu.memory_space<vmem>>, vector<1x64x8xf32>,
    return
  }
  func.func @transform_0(%arg0: i32, %arg1: i32) -> (i32, i32, i32) {
    %c0_i32 = arith.constant 0 : i32
    %c0_i32_0 = arith.constant 0 : i32
    return %arg0, %c0_i32, %arg1 : i32, i32, i32
  }
  func.func @transform_1(%arg0: i32, %arg1: i32) -> (i32, i32) {
    %c0_i32 = arith.constant 0 : i32
    %c0_i32_0 = arith.constant 0 : i32
    %c0_i32_1 = arith.constant 0 : i32
    return %c0_i32, %c0_i32_0 : i32, i32
  }
  func.func @transform_2(%arg0: i32, %arg1: i32) -> (i32, i32) {
    %c0_i32 = arith.constant 0 : i32
    %c0_i32_0 = arith.constant 0 : i32
    %c0_i32_1 = arith.constant 0 : i32
    return %c0_i32, %c0_i32_0 : i32, i32
  }
  func.func @transform_3(%arg0: i32, %arg1: i32) -> (i32, i32, i32) {
    %c0_i32 = arith.constant 0 : i32
    %c0_i32_0 = arith.constant 0 : i32
    return %arg0, %c0_i32, %arg1 : i32, i32, i32
  }
}

</mosaic_0001>

<bundles_post_ra>
// kernel: tpu_custom_call.1
= control target key start
LH: loop header
LB: loop body
LE: loop exit
PB: predicated region body
PF: predicated region fallthrough
CT: control target
= control target key end

     0   :  { %s857_s12 = smov 0   ;;  %s859_s13 = smov 0   ;;  %s1202_s0 = inlined_call_operand.vmem [shape: f32[2,768,8], index: 0, kind: input, shape index: {}]   ;;  %s1203_s1 = inlined_call_operand.vmem [shape: f32[64,768], index: 1, kind: input, shape index: {}]   ;;  %s1204_s2 = inlined_call_operand.vmem [shape: f32[64,1], index: 2, kind: input, shape index: {}]   ;;  %s1205_s3 = inlined_call_operand.vmem [shape: f32[2,64,8], index: 3, kind: output, shape index: {}]  }
   0x1   :  { %s861_s14 = smov 0  }
   0x2 LB: > { %s25_s15 = sadd.s32 1, %s830_s13  ;;  %p744_p0 = scmp.ge.s32.totalorder %s834_s14, 1  ;;  %s834_s14 = sphi %s861_s14, %s13_s14   ;;  %s830_s13 = sphi %s859_s13, %s1207_s13   ;;  %s826_s12 = sphi %s857_s12, %s1206_s12  }
   0x3   : > { %p27_p1 = scmp.ge.s32.totalorder %s25_s15, 2  ;;  %p156_p2 = scmp.lt.s32.totalorder %s834_s14, 3 }
   0x5   : > { %s1209_s15 = smov (%p27_p1, %s25_s15), 0  ;;  %p157_p3 = pnand %p744_p0, %p156_p2 }
   0x6   : > { %p186_p4 = scmp.lt.s32.totalorder (!%p157_p3), %s826_s12, 1 }
   0x7   : > { %160 = sbr.rel (%p157_p3) target bundleno = 284 (0x11c), region = 32 }
   0xc   : > { %s1211_s12 = smov (!%p186_p4, %s826_s12), 1  ;;  %v226_v32 = vld [vmem:[%s1203_s1 + $0xc0] sm:$0xff]  ;;  %v227_v33 = vld [vmem:[%s1203_s1 + $0xc8] sm:$0xff]  ;;  %v232_v46 = vld [vmem:[%s1203_s1 + $0xf0] sm:$0xff]  ;;  %v836_v60 = vmov 0   ;;  %vm648_vm0 = vcmask 64512  }
   0xd   : > { %s783_s16 = smul.u32 768, %s1211_s12  ;;  %v202_v38 = vld [vmem:[%s1203_s1] sm:$0xff]  ;;  %v203_v39 = vld [vmem:[%s1203_s1 + $0x8] sm:$0xff]  ;;  %v233_v47 = vld [vmem:[%s1203_s1 + $0xf8] sm:$0xff]  ;;  %809 = vset.pattern.permute.xlu0 %v836_v60  ;;  %810 = vset.pattern.permute.xlu1 %v836_v60  ;;  %s750_s18 = sshll.u32 %s1211_s12, 6 }
   0xe   : > { %v238_v62 = vld [vmem:[%s1203_s1 + $0x120] sm:$0xff]  ;;  %811 = vset.pattern.permute.xlu2 %v836_v60  ;;  %s1168_s22 = scalar_lea.vmem %s1205_s3, %s750_s18 }
   0xf   : > { %s881_s19 = scalar_lea.vmem %s1202_s0, %s783_s16  ;;  %v250_v63 = vld [vmem:[%s1204_s2] sm:$0xff] }
  0x10   : > { %v273_v0 = vld [vmem:[%s881_s19 + $0x78] sm:$0xff]  ;;  %v272_v1 = vld [vmem:[%s881_s19 + $0x70] sm:$0xff]  ;;  %v271_v4 = vld [vmem:[%s881_s19 + $0x68] sm:$0xff]  ;;  %356 = vperm.xlu0 %809, %v250_v63  }
  0x11   : > { %v289_v2 = vld [vmem:[%s881_s19 + $0xf8] sm:$0xff]  ;;  %751 = vmatpush.msra.mxu2 %v273_v0  ;;  %v288_v3 = vld [vmem:[%s881_s19 + $0xf0] sm:$0xff]  ;;  %v287_v5 = vld [vmem:[%s881_s19 + $0xe8] sm:$0xff]  ;;  %394 = vmatpush.msra.mxu0 %v273_v0 }
  0x12   : > { %767 = vmatpush.msra.mxu3 %v289_v2  ;;  %435 = vmatpush.msra.mxu1 %v289_v2  ;;  %v270_v6 = vld [vmem:[%s881_s19 + $0x60] sm:$0xff]  ;;  %v269_v8 = vld [vmem:[%s881_s19 + $0x58] sm:$0xff]  ;;  %v268_v10 = vld [vmem:[%s881_s19 + $0x50] sm:$0xff] }
  0x13   : > { %752 = vmatpush.msra.mxu2 %v272_v1  ;;  %v286_v7 = vld [vmem:[%s881_s19 + $0xe0] sm:$0xff]  ;;  %395 = vmatpush.msra.mxu0 %v272_v1  ;;  %v285_v9 = vld [vmem:[%s881_s19 + $0xd8] sm:$0xff]  ;;  %v284_v11 = vld [vmem:[%s881_s19 + $0xd0] sm:$0xff] }
  0x14   : > { %768 = vmatpush.msra.mxu3 %v288_v3  ;;  %436 = vmatpush.msra.mxu1 %v288_v3  ;;  %v267_v12 = vld [vmem:[%s881_s19 + $0x48] sm:$0xff]  ;;  %v266_v14 = vld [vmem:[%s881_s19 + $0x40] sm:$0xff]  ;;  %v265_v16 = vld [vmem:[%s881_s19 + $0x38] sm:$0xff] }
  0x15   : > { %753 = vmatpush.msra.mxu2 %v271_v4  ;;  %396 = vmatpush.msra.mxu0 %v271_v4  ;;  %v283_v13 = vld [vmem:[%s881_s19 + $0xc8] sm:$0xff]  ;;  %v282_v15 = vld [vmem:[%s881_s19 + $0xc0] sm:$0xff]  ;;  %v281_v17 = vld [vmem:[%s881_s19 + $0xb8] sm:$0xff] }
  0x16   : > { %769 = vmatpush.msra.mxu3 %v287_v5  ;;  %437 = vmatpush.msra.mxu1 %v287_v5  ;;  %v264_v18 = vld [vmem:[%s881_s19 + $0x30] sm:$0xff]  ;;  %v263_v20 = vld [vmem:[%s881_s19 + $0x28] sm:$0xff]  ;;  %v262_v22 = vld [vmem:[%s881_s19 + $0x20] sm:$0xff] }
  0x17   : > { %754 = vmatpush.msra.mxu2 %v270_v6  ;;  %397 = vmatpush.msra.mxu0 %v270_v6  ;;  %v280_v19 = vld [vmem:[%s881_s19 + $0xb0] sm:$0xff]  ;;  %v279_v21 = vld [vmem:[%s881_s19 + $0xa8] sm:$0xff]  ;;  %v278_v23 = vld [vmem:[%s881_s19 + $0xa0] sm:$0xff] }
  0x18   : > { %770 = vmatpush.msra.mxu3 %v286_v7  ;;  %438 = vmatpush.msra.mxu1 %v286_v7  ;;  %v261_v24 = vld [vmem:[%s881_s19 + $0x18] sm:$0xff]  ;;  %v260_v26 = vld [vmem:[%s881_s19 + $0x10] sm:$0xff]  ;;  %v259_v28 = vld [vmem:[%s881_s19 + $0x8] sm:$0xff] }
  0x19   : > { %755 = vmatpush.msra.mxu2 %v269_v8  ;;  %398 = vmatpush.msra.mxu0 %v269_v8  ;;  %v277_v25 = vld [vmem:[%s881_s19 + $0x98] sm:$0xff]  ;;  %v276_v27 = vld [vmem:[%s881_s19 + $0x90] sm:$0xff]  ;;  %v275_v29 = vld [vmem:[%s881_s19 + $0x88] sm:$0xff] }
  0x1a   : > { %771 = vmatpush.msra.mxu3 %v285_v9  ;;  %439 = vmatpush.msra.mxu1 %v285_v9  ;;  %v258_v30 = vld [vmem:[%s881_s19] sm:$0xff]  ;;  %v305_v34 = vld [vmem:[%s881_s19 + $0x178] sm:$0xff]  ;;  %v304_v36 = vld [vmem:[%s881_s19 + $0x170] sm:$0xff] }
  0x1b   : > { %756 = vmatpush.msra.mxu2 %v268_v10  ;;  %399 = vmatpush.msra.mxu0 %v268_v10  ;;  %v274_v31 = vld [vmem:[%s881_s19 + $0x80] sm:$0xff]  ;;  %v321_v35 = vld [vmem:[%s881_s19 + $0x1f8] sm:$0xff]  ;;  %v320_v37 = vld [vmem:[%s881_s19 + $0x1f0] sm:$0xff] }
  0x1c   : > { %772 = vmatpush.msra.mxu3 %v284_v11  ;;  %440 = vmatpush.msra.mxu1 %v284_v11  ;;  %v303_v40 = vld [vmem:[%s881_s19 + $0x168] sm:$0xff]  ;;  %v337_v42 = vld [vmem:[%s881_s19 + $0x278] sm:$0xff]  ;;  %v302_v44 = vld [vmem:[%s881_s19 + $0x160] sm:$0xff] }
  0x1d   : > { %757 = vmatpush.msra.mxu2 %v267_v12  ;;  %400 = vmatpush.msra.mxu0 %v267_v12  ;;  %v319_v41 = vld [vmem:[%s881_s19 + $0x1e8] sm:$0xff]  ;;  %v353_v43 = vld [vmem:[%s881_s19 + $0x2f8] sm:$0xff]  ;;  %v318_v45 = vld [vmem:[%s881_s19 + $0x1e0] sm:$0xff] }
  0x1e   : > { %773 = vmatpush.msra.mxu3 %v283_v13  ;;  %441 = vmatpush.msra.mxu1 %v283_v13  ;;  %v301_v48 = vld [vmem:[%s881_s19 + $0x158] sm:$0xff]  ;;  %v336_v50 = vld [vmem:[%s881_s19 + $0x270] sm:$0xff]  ;;  %v335_v54 = vld [vmem:[%s881_s19 + $0x268] sm:$0xff] }
  0x1f   : > { %758 = vmatpush.msra.mxu2 %v266_v14  ;;  %401 = vmatpush.msra.mxu0 %v266_v14  ;;  %v317_v49 = vld [vmem:[%s881_s19 + $0x1d8] sm:$0xff]  ;;  %v352_v51 = vld [vmem:[%s881_s19 + $0x2f0] sm:$0xff]  ;;  %v299_v55 = vld [vmem:[%s881_s19 + $0x148] sm:$0xff] }
  0x20   : > { %774 = vmatpush.msra.mxu3 %v282_v15  ;;  %442 = vmatpush.msra.mxu1 %v282_v15  ;;  %v300_v52 = vld [vmem:[%s881_s19 + $0x150] sm:$0xff]  ;;  %v315_v56 = vld [vmem:[%s881_s19 + $0x1c8] sm:$0xff]  ;;  %v334_v57 = vld [vmem:[%s881_s19 + $0x260] sm:$0xff] }
  0x21   : > { %759 = vmatpush.msra.mxu2 %v265_v16  ;;  %402 = vmatpush.msra.mxu0 %v265_v16  ;;  %v316_v53 = vld [vmem:[%s881_s19 + $0x1d0] sm:$0xff]  ;;  %v351_v58 = vld [vmem:[%s881_s19 + $0x2e8] sm:$0xff]  ;;  %v298_v59 = vld [vmem:[%s881_s19 + $0x140] sm:$0xff] }
  0x22   : > { %775 = vmatpush.msra.mxu3 %v281_v17  ;;  %443 = vmatpush.msra.mxu1 %v281_v17  ;;  %v314_v61 = vld [vmem:[%s881_s19 + $0x1c0] sm:$0xff]  ;;  %v297_v0 = vld [vmem:[%s881_s19 + $0x138] sm:$0xff]  ;;  %v208_v1 = vld [vmem:[%s1203_s1 + $0x30] sm:$0xff] }
  0x23   : > { %760 = vmatpush.msra.mxu2 %v264_v18  ;;  %403 = vmatpush.msra.mxu0 %v264_v18  ;;  %v239_v2 = vld [vmem:[%s1203_s1 + $0x128] sm:$0xff]  ;;  %v333_v3 = vld [vmem:[%s881_s19 + $0x258] sm:$0xff]  ;;  %v296_v4 = vld [vmem:[%s881_s19 + $0x130] sm:$0xff] }
  0x24   : > { %776 = vmatpush.msra.mxu3 %v280_v19  ;;  %444 = vmatpush.msra.mxu1 %v280_v19  ;;  %v313_v5 = vld [vmem:[%s881_s19 + $0x1b8] sm:$0xff]  ;;  %v350_v6 = vld [vmem:[%s881_s19 + $0x2e0] sm:$0xff]  ;;  %v332_v7 = vld [vmem:[%s881_s19 + $0x250] sm:$0xff] }
  0x25   : > { %761 = vmatpush.msra.mxu2 %v263_v20  ;;  %404 = vmatpush.msra.mxu0 %v263_v20  ;;  %v209_v8 = vld [vmem:[%s1203_s1 + $0x38] sm:$0xff]  ;;  %v295_v9 = vld [vmem:[%s881_s19 + $0x128] sm:$0xff]  ;;  %v312_v10 = vld [vmem:[%s881_s19 + $0x1b0] sm:$0xff] }
  0x26   : > { %777 = vmatpush.msra.mxu3 %v279_v21  ;;  %445 = vmatpush.msra.mxu1 %v279_v21  ;;  %v349_v11 = vld [vmem:[%s881_s19 + $0x2d8] sm:$0xff]  ;;  %v294_v12 = vld [vmem:[%s881_s19 + $0x120] sm:$0xff]  ;;  %v331_v13 = vld [vmem:[%s881_s19 + $0x248] sm:$0xff] }
  0x27   : > { %762 = vmatpush.msra.mxu2 %v262_v22  ;;  %405 = vmatpush.msra.mxu0 %v262_v22  ;;  %v311_v14 = vld [vmem:[%s881_s19 + $0x1a8] sm:$0xff]  ;;  %v348_v15 = vld [vmem:[%s881_s19 + $0x2d0] sm:$0xff]  ;;  %v293_v17 = vld [vmem:[%s881_s19 + $0x118] sm:$0xff] }
  0x28   : > { %778 = vmatpush.msra.mxu3 %v278_v23  ;;  %446 = vmatpush.msra.mxu1 %v278_v23  ;;  %v244_v16 = vld [vmem:[%s1203_s1 + $0x150] sm:$0xff]  ;;  %v310_v18 = vld [vmem:[%s881_s19 + $0x1a0] sm:$0xff]  ;;  %v347_v20 = vld [vmem:[%s881_s19 + $0x2c8] sm:$0xff] }
  0x29   : > { %763 = vmatpush.msra.mxu2 %v261_v24  ;;  %406 = vmatpush.msra.mxu0 %v261_v24  ;;  %v330_v19 = vld [vmem:[%s881_s19 + $0x240] sm:$0xff]  ;;  %v252_v21 = vld [vmem:[%s1204_s2 + $0x10] sm:$0xff]  ;;  %v251_v22 = vld [vmem:[%s1204_s2 + $0x8] sm:$0xff] }
  0x2a   : > { %779 = vmatpush.msra.mxu3 %v277_v25  ;;  %447 = vmatpush.msra.mxu1 %v277_v25  ;;  %v214_v23 = vld [vmem:[%s1203_s1 + $0x60] sm:$0xff]  ;;  %v245_v24 = vld [vmem:[%s1203_s1 + $0x158] sm:$0xff]  ;;  %v292_v25 = vld [vmem:[%s881_s19 + $0x110] sm:$0xff] }
  0x2b   : > { %764 = vmatpush.msra.mxu2 %v260_v26  ;;  %407 = vmatpush.msra.mxu0 %v260_v26  ;;  %v309_v26 = vld [vmem:[%s881_s19 + $0x198] sm:$0xff]  ;;  %v338_v60 = vld [vmem:[%s881_s19 + $0x280] sm:$0xff]  ;;  %v216_v63 = vld [vmem:[%s1203_s1 + $0x70] sm:$0xff] }
  0x2c   : > { %780 = vmatpush.msra.mxu3 %v276_v27  ;;  %448 = vmatpush.msra.mxu1 %v276_v27  ;;  %v329_v27 = vld [vmem:[%s881_s19 + $0x238] sm:$0xff] }
  0x2d   : > { %765 = vmatpush.msra.mxu2 %v259_v28  ;;  %408 = vmatpush.msra.mxu0 %v259_v28  ;;  %v346_v28 = vld [vmem:[%s881_s19 + $0x2c0] sm:$0xff] }
  0x2e   : > { %781 = vmatpush.msra.mxu3 %v275_v29  ;;  %449 = vmatpush.msra.mxu1 %v275_v29  ;;  %v215_v29 = vld [vmem:[%s1203_s1 + $0x68] sm:$0xff] }
  0x2f   : > { %766 = vmatpush.msra.mxu2 %v258_v30  ;;  %409 = vmatpush.msra.mxu0 %v258_v30  ;;  %v291_v30 = vld [vmem:[%s881_s19 + $0x108] sm:$0xff] }
  0x30   : > { %782 = vmatpush.msra.mxu3 %v274_v31  ;;  %422 = vmatmul.f32.vlgmr.msra.gmra.mxu2 %v226_v32  ;;  %v328_v32 = vld [vmem:[%s881_s19 + $0x230] sm:$0xff] }
  0x31   : > { %463 = vmatmul.f32.vlgmr.msra.gmra.mxu3 %v227_v33  ;;  %476 = vmatpush.msrb.mxu2 %v305_v34  ;;  %v345_v33 = vld [vmem:[%s881_s19 + $0x2b8] sm:$0xff]  ;;  %v290_v34 = vld [vmem:[%s881_s19 + $0x100] sm:$0xff] }
  0x32   : > { %517 = vmatpush.msrb.mxu3 %v321_v35  ;;  %450 = vmatpush.msra.mxu1 %v274_v31  ;;  %v308_v31 = vld [vmem:[%s881_s19 + $0x190] sm:$0xff]  ;;  %v307_v35 = vld [vmem:[%s881_s19 + $0x188] sm:$0xff] }
  0x33   : > { %477 = vmatpush.msrb.mxu2 %v304_v36  ;;  %410 = vmatmul.f32.vlgmr.msra.gmra.mxu0 %v202_v38  ;;  %v327_v36 = vld [vmem:[%s881_s19 + $0x228] sm:$0xff]  ;;  %v204_v38 = vld [vmem:[%s1203_s1 + $0x10] sm:$0xff] }
  0x34   : > { %518 = vmatpush.msrb.mxu3 %v320_v37  ;;  %451 = vmatmul.f32.vlgmr.msra.gmra.mxu1 %v203_v39  ;;  %v344_v37 = vld [vmem:[%s881_s19 + $0x2b0] sm:$0xff]  ;;  %v306_v39 = vld [vmem:[%s881_s19 + $0x180] sm:$0xff] }
  0x35   : > { %478 = vmatpush.msrb.mxu2 %v303_v40  ;;  %558 = vmatpush.msrb.mxu0 %v337_v42  ;;  %v326_v40 = vld [vmem:[%s881_s19 + $0x220] sm:$0xff]  ;;  %v253_v42 = vld [vmem:[%s1204_s2 + $0x18] sm:$0xff] }
  0x36   : > { %519 = vmatpush.msrb.mxu3 %v319_v41  ;;  %599 = vmatpush.msrb.mxu1 %v353_v43  ;;  %v343_v41 = vld [vmem:[%s881_s19 + $0x2a8] sm:$0xff]  ;;  %v256_v43 = vld [vmem:[%s1204_s2 + $0x30] sm:$0xff] }
  0x37   : > { %479 = vmatpush.msrb.mxu2 %v302_v44  ;;  %559 = vmatpush.msrb.mxu0 %v336_v50  ;;  %v220_v44 = vld [vmem:[%s1203_s1 + $0x90] sm:$0xff]  ;;  %v341_v50 = vld [vmem:[%s881_s19 + $0x298] sm:$0xff] }
  0x38   : > { %520 = vmatpush.msrb.mxu3 %v318_v45  ;;  %425 = vmatmul.f32.gmra.mxu2 %v232_v46  ;;  %v205_v45 = vld [vmem:[%s1203_s1 + $0x18] sm:$0xff] }
  0x39   : > { %466 = vmatmul.f32.gmra.mxu3 %v233_v47  ;;  %480 = vmatpush.msrb.mxu2 %v301_v48  ;;  %v325_v46 = vld [vmem:[%s881_s19 + $0x218] sm:$0xff]  ;;  %v342_v47 = vld [vmem:[%s881_s19 + $0x2a0] sm:$0xff] }
  0x3a   : > { %521 = vmatpush.msrb.mxu3 %v317_v49  ;;  %600 = vmatpush.msrb.mxu1 %v352_v51  ;;  %v221_v48 = vld [vmem:[%s1203_s1 + $0x98] sm:$0xff]  ;;  %v324_v49 = vld [vmem:[%s881_s19 + $0x210] sm:$0xff]  ;;  %v254_v51 = vld [vmem:[%s1204_s2 + $0x20] sm:$0xff] }
  0x3b   : > { %481 = vmatpush.msrb.mxu2 %v300_v52  ;;  %560 = vmatpush.msrb.mxu0 %v335_v54  ;;  %v323_v52 = vld [vmem:[%s881_s19 + $0x208] sm:$0xff]  ;;  %v340_v54 = vld [vmem:[%s881_s19 + $0x290] sm:$0xff] }
  0x3c   : > { %522 = vmatpush.msrb.mxu3 %v316_v53  ;;  %601 = vmatpush.msrb.mxu1 %v351_v58  ;;  %v210_v53 = vld [vmem:[%s1203_s1 + $0x40] sm:$0xff] }
  0x3d   : > { %482 = vmatpush.msrb.mxu2 %v299_v55  ;;  %561 = vmatpush.msrb.mxu0 %v334_v57  ;;  %v322_v55 = vld [vmem:[%s881_s19 + $0x200] sm:$0xff]  ;;  %v339_v57 = vld [vmem:[%s881_s19 + $0x288] sm:$0xff] }
  0x3e   : > { %523 = vmatpush.msrb.mxu3 %v315_v56  ;;  %413 = vmatmul.f32.gmra.mxu0 %v208_v1  ;;  %v257_v56 = vld [vmem:[%s1204_s2 + $0x38] sm:$0xff]  ;;  %v206_v58 = vld [vmem:[%s1203_s1 + $0x20] sm:$0xff] }
  0x3f   : > { %483 = vmatpush.msrb.mxu2 %v298_v59  ;;  %562 = vmatpush.msrb.mxu0 %v333_v3  ;;  %v211_v59 = vld [vmem:[%s1203_s1 + $0x48] sm:$0xff]  ;;  %v217_v1 = vld [vmem:[%s1203_s1 + $0x78] sm:$0xff]  ;;  %v222_v3 = vld [vmem:[%s1203_s1 + $0xa0] sm:$0xff] }
  0x40   : > { %524 = vmatpush.msrb.mxu3 %v314_v61  ;;  %428 = vmatmul.f32.gmra.mxu2 %v238_v62  ;;  %v207_v61 = vld [vmem:[%s1203_s1 + $0x28] sm:$0xff] }
  0x41   : > { %484 = vmatpush.msrb.mxu2 %v297_v0  ;;  %469 = vmatmul.f32.gmra.mxu3 %v239_v2  ;;  %v255_v62 = vld [vmem:[%s1204_s2 + $0x28] sm:$0xff]  ;;  %v212_v0 = vld [vmem:[%s1203_s1 + $0x50] sm:$0xff]  ;;  %v213_v2 = vld [vmem:[%s1203_s1 + $0x58] sm:$0xff] }
  0x42   : > { %525 = vmatpush.msrb.mxu3 %v313_v5  ;;  %602 = vmatpush.msrb.mxu1 %v350_v6  ;;  %v223_v5 = vld [vmem:[%s1203_s1 + $0xa8] sm:$0xff] }
  0x43   : > { %485 = vmatpush.msrb.mxu2 %v296_v4  ;;  %563 = vmatpush.msrb.mxu0 %v332_v7  ;;  %v218_v4 = vld [vmem:[%s1203_s1 + $0x80] sm:$0xff]  ;;  %v219_v6 = vld [vmem:[%s1203_s1 + $0x88] sm:$0xff]  ;;  %v228_v7 = vld [vmem:[%s1203_s1 + $0xd0] sm:$0xff] }
  0x44   : > { %454 = vmatmul.f32.gmra.mxu1 %v209_v8  ;;  %526 = vmatpush.msrb.mxu3 %v312_v10  ;;  %v224_v8 = vld [vmem:[%s1203_s1 + $0xb0] sm:$0xff]  ;;  %v225_v10 = vld [vmem:[%s1203_s1 + $0xb8] sm:$0xff] }
  0x45   : > { %486 = vmatpush.msrb.mxu2 %v295_v9  ;;  %603 = vmatpush.msrb.mxu1 %v349_v11  ;;  %v229_v9 = vld [vmem:[%s1203_s1 + $0xd8] sm:$0xff]  ;;  %v234_v11 = vld [vmem:[%s1203_s1 + $0x100] sm:$0xff] }
  0x46   : > { %564 = vmatpush.msrb.mxu0 %v331_v13  ;;  %527 = vmatpush.msrb.mxu3 %v311_v14  ;;  %v235_v13 = vld [vmem:[%s1203_s1 + $0x108] sm:$0xff] }
  0x47   : > { %487 = vmatpush.msrb.mxu2 %v294_v12  ;;  %604 = vmatpush.msrb.mxu1 %v348_v15  ;;  %v230_v12 = vld [vmem:[%s1203_s1 + $0xe0] sm:$0xff]  ;;  %v231_v14 = vld [vmem:[%s1203_s1 + $0xe8] sm:$0xff]  ;;  %v240_v15 = vld [vmem:[%s1203_s1 + $0x130] sm:$0xff] }
  0x48   : > { %431 = vmatmul.f32.gmra.mxu2 %v244_v16  ;;  %528 = vmatpush.msrb.mxu3 %v310_v18  ;;  %v236_v16 = vld [vmem:[%s1203_s1 + $0x110] sm:$0xff]  ;;  %v237_v18 = vld [vmem:[%s1203_s1 + $0x118] sm:$0xff] }
  0x49   : > { %488 = vmatpush.msrb.mxu2 %v293_v17  ;;  %565 = vmatpush.msrb.mxu0 %v330_v19  ;;  %v241_v17 = vld [vmem:[%s1203_s1 + $0x138] sm:$0xff]  ;;  %v246_v19 = vld [vmem:[%s1203_s1 + $0x160] sm:$0xff] }
  0x4a   : > { %605 = vmatpush.msrb.mxu1 %v347_v20  ;;  %366 = vperm.xlu1 %810, %v252_v21   ;;  %v242_v20 = vld [vmem:[%s1203_s1 + $0x140] sm:$0xff]  ;;  %v247_v21 = vld [vmem:[%s1203_s1 + $0x168] sm:$0xff] }
  0x4b   : > { %361 = vperm.xlu0 %809, %v251_v22   ;;  %416 = vmatmul.f32.gmra.mxu0 %v214_v23  ;;  %v243_v22 = vld [vmem:[%s1203_s1 + $0x148] sm:$0xff]  ;;  %v248_v23 = vld [vmem:[%s1203_s1 + $0x170] sm:$0xff] }
  0x4c   : > { %472 = vmatmul.f32.gmra.mxu3 %v245_v24  ;;  %489 = vmatpush.msrb.mxu2 %v292_v25  ;;  %v249_v24 = vld [vmem:[%s1203_s1 + $0x178] sm:$0xff] }
  0x4d   : > { %529 = vmatpush.msrb.mxu3 %v309_v26  ;;  %566 = vmatpush.msrb.mxu0 %v329_v27 }
  0x4e   : > { %606 = vmatpush.msrb.mxu1 %v346_v28  ;;  %490 = vmatpush.msrb.mxu2 %v291_v30 }
  0x4f   : > { %457 = vmatmul.f32.gmra.mxu1 %v215_v29  ;;  %530 = vmatpush.msrb.mxu3 %v308_v31 }
  0x50   : > { %567 = vmatpush.msrb.mxu0 %v328_v32  ;;  %607 = vmatpush.msrb.mxu1 %v345_v33 }
  0x51   : > { %491 = vmatpush.msrb.mxu2 %v290_v34  ;;  %531 = vmatpush.msrb.mxu3 %v307_v35 }
  0x52   : > { %568 = vmatpush.msrb.mxu0 %v327_v36  ;;  %608 = vmatpush.msrb.mxu1 %v344_v37 }
  0x53   : > { %492 = vmatmul.f32.vlgmr.msrb.gmra.mxu2 %v204_v38  ;;  %532 = vmatpush.msrb.mxu3 %v306_v39 }
  0x54   : > { %569 = vmatpush.msrb.mxu0 %v326_v40  ;;  %609 = vmatpush.msrb.mxu1 %v343_v41 }
  0x55   : > { %371 = vperm.xlu1 %810, %v253_v42   ;;  %386 = vperm.xlu0 %809, %v256_v43  }
  0x56   : > { %419 = vmatmul.f32.gmra.mxu0 %v220_v44  ;;  %533 = vmatmul.f32.vlgmr.msrb.gmra.mxu3 %v205_v45 }
  0x57   : > { %570 = vmatpush.msrb.mxu0 %v325_v46  ;;  %610 = vmatpush.msrb.mxu1 %v342_v47 }
  0x58   : > { %460 = vmatmul.f32.gmra.mxu1 %v221_v48  ;;  %376 = vperm.xlu2 %811, %v254_v51  }
  0x59   : > { %571 = vmatpush.msrb.mxu0 %v324_v49  ;;  %611 = vmatpush.msrb.mxu1 %v341_v50 }
  0x5b   : > { %572 = vmatpush.msrb.mxu0 %v323_v52  ;;  %495 = vmatmul.f32.gmra.mxu2 %v210_v53 }
  0x5c   : > { %612 = vmatpush.msrb.mxu1 %v340_v54 }
  0x5d   : > { %573 = vmatpush.msrb.mxu0 %v322_v55  ;;  %391 = vperm.xlu1 %810, %v257_v56  }
  0x5e   : > { %613 = vmatpush.msrb.mxu1 %v339_v57  ;;  %574 = vmatmul.f32.vlgmr.msrb.gmra.mxu0 %v206_v58 }
  0x5f   : > { %536 = vmatmul.f32.gmra.mxu3 %v211_v59 }
  0x60   : > { %614 = vmatpush.msrb.mxu1 %v338_v60  ;;  %381 = vperm.xlu2 %811, %v255_v62  }
  0x61   : > { %615 = vmatmul.f32.vlgmr.msrb.gmra.mxu1 %v207_v61 }
  0x63   : > { %498 = vmatmul.f32.gmra.mxu2 %v216_v63 }
  0x66   : > { %577 = vmatmul.f32.gmra.mxu0 %v212_v0 }
  0x67   : > { %539 = vmatmul.f32.gmra.mxu3 %v217_v1 }
  0x69   : > { %618 = vmatmul.f32.gmra.mxu1 %v213_v2 }
  0x6b   : > { %501 = vmatmul.f32.gmra.mxu2 %v222_v3 }
  0x6e   : > { %580 = vmatmul.f32.gmra.mxu0 %v218_v4 }
  0x6f   : > { %542 = vmatmul.f32.gmra.mxu3 %v223_v5 }
  0x71   : > { %621 = vmatmul.f32.gmra.mxu1 %v219_v6 }
  0x73   : > { %504 = vmatmul.f32.gmra.mxu2 %v228_v7 }
  0x76   : > { %583 = vmatmul.f32.gmra.mxu0 %v224_v8 }
  0x77   : > { %545 = vmatmul.f32.gmra.mxu3 %v229_v9 }
  0x79   : > { %624 = vmatmul.f32.gmra.mxu1 %v225_v10 }
  0x7b   : > { %507 = vmatmul.f32.gmra.mxu2 %v234_v11 }
  0x7e   : > { %586 = vmatmul.f32.gmra.mxu0 %v230_v12 }
  0x7f   : > { %548 = vmatmul.f32.gmra.mxu3 %v235_v13 }
  0x81   : > { %627 = vmatmul.f32.gmra.mxu1 %v231_v14 }
  0x82   : > { %v357_v38 = vpop.permute.xlu0 %356 }
  0x83   : > { %510 = vmatmul.f32.gmra.mxu2 %v240_v15 }
  0x86   : > { %589 = vmatmul.f32.gmra.mxu0 %v236_v16 }
  0x87   : > { %551 = vmatmul.f32.gmra.mxu3 %v241_v17 }
  0x89   : > { %630 = vmatmul.f32.gmra.mxu1 %v237_v18 }
  0x8b   : > { %513 = vmatmul.f32.gmra.mxu2 %v246_v19 }
  0x8e   : > { %592 = vmatmul.f32.gmra.mxu0 %v242_v20 }
  0x8f   : > { %554 = vmatmul.f32.gmra.mxu3 %v247_v21 }
  0x91   : > { %633 = vmatmul.f32.gmra.mxu1 %v243_v22 }
  0x96   : > { %595 = vmatmul.f32.gmra.mxu0 %v248_v23 }
  0x99   : > { %636 = vmatmul.f32.gmra.mxu1 %v249_v24 }
  0xb0   : > { %v411_v27 = vpop.f32.mrf.mxu0 }
  0xb1   : > { %v452_v28 = vpop.f32.mrf.mxu1  ;;  %v412_v40 = vadd.f32 %v411_v27, %v357_v38 }
  0xb2   : > { %v377_v9 = vpop.permute.xlu2 %376 }
  0xb3   : > { %v423_v25 = vpop.f32.mrf.mxu2  ;;  %v453_v42 = vadd.f32 %v452_v28, %v412_v40 }
  0xb4   : > { %v1150_v26 = vpop.f32.mrf.mxu3  ;;  %v424_v18 = vadd.f32 %v423_v25, %v377_v9 }
  0xb6   : > { %v465_v23 = vadd.f32 %v1150_v26, %v424_v18 }
  0xba   : > { %v382_v24 = vpop.permute.xlu2 %381 }
  0xbb   : > { %v1152_v29 = vpop.f32.mrf.mxu2  ;;  %v414_v31 = vpop.f32.mrf.mxu0 }
  0xbc   : > { %v1154_v30 = vpop.f32.mrf.mxu3  ;;  %v367_v51 = vpop.permute.xlu1 %366 }
  0xbd   : > { %v362_v46 = vpop.permute.xlu0 %361 }
  0xbe   : > { %v415_v47 = vadd.f32 %v414_v31, %v362_v46 }
  0xc1   : > { %v455_v32 = vpop.f32.mrf.mxu1 }
  0xc2   : > { %v456_v52 = vadd.f32 %v455_v32, %v415_v47 }
  0xc3   : > { %v1156_v33 = vpop.f32.mrf.mxu2 }
  0xc4   : > { %v1158_v34 = vpop.f32.mrf.mxu3 }
  0xc7   : > { %v372_v5 = vpop.permute.xlu1 %371 }
  0xc8   : > { %v417_v35 = vpop.f32.mrf.mxu0 }
  0xc9   : > { %v418_v58 = vadd.f32 %v417_v35, %v367_v51 }
  0xcb   : > { %v1160_v37 = vpop.f32.mrf.mxu2 }
  0xcc   : > { %v458_v36 = vpop.f32.mrf.mxu1 }
  0xcd   : > { %v459_v63 = vadd.f32 %v458_v36, %v418_v58  ;;  %v427_v36 = vadd.f32 %v1152_v29, %v382_v24 }
  0xcf   : > { %v1162_v39 = vpop.f32.mrf.mxu3 }
  0xd3   : > { %v420_v41 = vpop.f32.mrf.mxu0 }
  0xd4   : > { %v421_v6 = vadd.f32 %v420_v41, %v372_v5 }
  0xd5   : > { %v461_v43 = vpop.f32.mrf.mxu1 }
  0xd6   : > { %v493_v44 = vpop.f32.mrf.mxu2  ;;  %v462_v12 = vadd.f32 %v461_v43, %v421_v6  ;;  %v387_v43 = vpop.permute.xlu0 %386 }
  0xd7   : > { %v494_v45 = vadd.f32 %v493_v44, %v453_v42  ;;  %v468_v42 = vadd.f32 %v1154_v30, %v427_v36 }
  0xd9   : > { %v534_v48 = vpop.f32.mrf.mxu3 }
  0xda   : > { %v535_v49 = vadd.f32 %v534_v48, %v494_v45  ;;  %v430_v48 = vadd.f32 %v1156_v33, %v387_v43 }
  0xdb   : > { %v575_v50 = vpop.f32.mrf.mxu0 }
  0xdc   : > { %v576_v53 = vadd.f32 %v575_v50, %v535_v49 }
  0xde   : > { %v616_v54 = vpop.f32.mrf.mxu1  ;;  %v496_v55 = vpop.f32.mrf.mxu2 }
  0xdf   : > { %v617_v56 = vadd.f32 %v616_v54, %v576_v53  ;;  %v497_v57 = vadd.f32 %v496_v55, %v456_v52  ;;  %v471_v52 = vadd.f32 %v1158_v34, %v430_v48  ;;  %v392_v53 = vpop.permute.xlu1 %391 }
  0xe0   : > { %v433_v58 = vadd.f32 %v1160_v37, %v392_v53 }
  0xe1   : > { %v640_v59 = vmax.f32 %v617_v56, 0.0 }
  0xe2   : > { %v537_v60 = vpop.f32.mrf.mxu3 }
  0xe3   : > { %649 = vst.msk [vmem:[%s1168_s22] sm:$0xff] %vm648_vm0, %v640_v59  ;;  %v538_v61 = vadd.f32 %v537_v60, %v497_v57  ;;  %v578_v62 = vpop.f32.mrf.mxu0 }
  0xe5   : > { %v579_v0 = vadd.f32 %v578_v62, %v538_v61  ;;  %v474_v62 = vadd.f32 %v1162_v39, %v433_v58 }
  0xe6   : > { %v619_v1 = vpop.f32.mrf.mxu1  ;;  %v499_v2 = vpop.f32.mrf.mxu2 }
  0xe7   : > { %v620_v3 = vadd.f32 %v619_v1, %v579_v0  ;;  %v500_v4 = vadd.f32 %v499_v2, %v459_v63 }
  0xe9   : > { %v641_v7 = vmax.f32 %v620_v3, 0.0 }
  0xea   : > { %v540_v8 = vpop.f32.mrf.mxu3 }
  0xeb   : > { %650 = vst.msk [vmem:[%s1168_s22 + $0x8] sm:$0xff] %vm648_vm0, %v641_v7  ;;  %v541_v10 = vadd.f32 %v540_v8, %v500_v4  ;;  %v581_v11 = vpop.f32.mrf.mxu0 }
  0xed   : > { %v582_v13 = vadd.f32 %v581_v11, %v541_v10 }
  0xee   : > { %v622_v14 = vpop.f32.mrf.mxu1  ;;  %v502_v15 = vpop.f32.mrf.mxu2 }
  0xef   : > { %v623_v16 = vadd.f32 %v622_v14, %v582_v13  ;;  %v503_v17 = vadd.f32 %v502_v15, %v462_v12 }
  0xf1   : > { %v642_v19 = vmax.f32 %v623_v16, 0.0 }
  0xf2   : > { %v543_v20 = vpop.f32.mrf.mxu3 }
  0xf3   : > { %651 = vst.msk [vmem:[%s1168_s22 + $0x10] sm:$0xff] %vm648_vm0, %v642_v19  ;;  %v544_v21 = vadd.f32 %v543_v20, %v503_v17  ;;  %v584_v22 = vpop.f32.mrf.mxu0 }
  0xf5   : > { %v585_v27 = vadd.f32 %v584_v22, %v544_v21 }
  0xf6   : > { %v625_v28 = vpop.f32.mrf.mxu1  ;;  %v505_v31 = vpop.f32.mrf.mxu2 }
  0xf7   : > { %v626_v32 = vadd.f32 %v625_v28, %v585_v27  ;;  %v506_v35 = vadd.f32 %v505_v31, %v465_v23 }
  0xf9   : > { %v643_v38 = vmax.f32 %v626_v32, 0.0 }
  0xfa   : > { %v546_v25 = vpop.f32.mrf.mxu3 }
  0xfb   : > { %652 = vst.msk [vmem:[%s1168_s22 + $0x18] sm:$0xff] %vm648_vm0, %v643_v38  ;;  %v547_v40 = vadd.f32 %v546_v25, %v506_v35  ;;  %v587_v41 = vpop.f32.mrf.mxu0 }
  0xfd   : > { %v588_v44 = vadd.f32 %v587_v41, %v547_v40 }
  0xfe   : > { %v628_v26 = vpop.f32.mrf.mxu1  ;;  %v508_v45 = vpop.f32.mrf.mxu2 }
  0xff   : > { %v629_v46 = vadd.f32 %v628_v26, %v588_v44  ;;  %v509_v47 = vadd.f32 %v508_v45, %v468_v42 }
 0x101   : > { %v644_v49 = vmax.f32 %v629_v46, 0.0 }
 0x102   : > { %v549_v29 = vpop.f32.mrf.mxu3 }
 0x103   : > { %653 = vst.msk [vmem:[%s1168_s22 + $0x20] sm:$0xff] %vm648_vm0, %v644_v49  ;;  %v550_v50 = vadd.f32 %v549_v29, %v509_v47  ;;  %v590_v51 = vpop.f32.mrf.mxu0 }
 0x105   : > { %v591_v54 = vadd.f32 %v590_v51, %v550_v50 }
 0x106   : > { %v631_v30 = vpop.f32.mrf.mxu1  ;;  %v511_v55 = vpop.f32.mrf.mxu2 }
 0x107   : > { %v632_v56 = vadd.f32 %v631_v30, %v591_v54  ;;  %v512_v57 = vadd.f32 %v511_v55, %v471_v52 }
 0x109   : > { %v645_v59 = vmax.f32 %v632_v56, 0.0 }
 0x10a   : > { %v552_v33 = vpop.f32.mrf.mxu3 }
 0x10b   : > { %654 = vst.msk [vmem:[%s1168_s22 + $0x28] sm:$0xff] %vm648_vm0, %v645_v59  ;;  %v553_v60 = vadd.f32 %v552_v33, %v512_v57  ;;  %v593_v61 = vpop.f32.mrf.mxu0 }
 0x10d   : > { %v594_v63 = vadd.f32 %v593_v61, %v553_v60 }
 0x10e   : > { %v634_v34 = vpop.f32.mrf.mxu1  ;;  %v514_v0 = vpop.f32.mrf.mxu2 }
 0x10f   : > { %v635_v1 = vadd.f32 %v634_v34, %v594_v63  ;;  %v515_v2 = vadd.f32 %v514_v0, %v474_v62 }
 0x111   : > { %v646_v3 = vmax.f32 %v635_v1, 0.0 }
 0x112   : > { %v555_v4 = vpop.f32.mrf.mxu3 }
 0x113   : > { %655 = vst.msk [vmem:[%s1168_s22 + $0x30] sm:$0xff] %vm648_vm0, %v646_v3  ;;  %v556_v5 = vadd.f32 %v555_v4, %v515_v2  ;;  %v596_v37 = vpop.f32.mrf.mxu0 }
 0x115   : > { %v597_v6 = vadd.f32 %v596_v37, %v556_v5 }
 0x116   : > { %v637_v7 = vpop.f32.mrf.mxu1 }
 0x117   : > { %v638_v8 = vadd.f32 %v637_v7, %v597_v6 }
 0x119   : > { %v647_v9 = vmax.f32 %v638_v8, 0.0 }
 0x11b   : > { %656 = vst.msk [vmem:[%s1168_s22 + $0x38] sm:$0xff] %vm648_vm0, %v647_v9 }
 0x11c PF: > { %s13_s14 = sadd.s32 1, %s834_s14   ;;  %s1206_s12 = smov %s830_s13 }
 0x11d   : > { %p10_p5 = scmp.ge.s32.totalorder %s13_s14, 4   ;;  %s1207_s13 = smov %s1209_s15 }
 0x11f   :  { %12 = sbr.rel (!%p10_p5) target bundleno = 2 (0x2), region = 62 }

</bundles_post_ra>
